<compile_context>
chip_gen: v6e
topology: v6e:2x2x1
jax: 0.10.0
libtpu: 0.0.40
codegen_flags: <defaults>
</compile_context>

<pallas_src>
import jax
import jax.numpy as jnp
from jax.experimental import pallas as pl
from jax.experimental.pallas import tpu as pltpu

LEAKY_SLOPE = 0.01
BN_EPS = 1e-5

# rows of the packed bias/BN operand
_ROW_B1, _ROW_B2, _ROW_BFCG1, _ROW_BG1, _ROW_BG2, _ROW_SCALE, _ROW_SHIFT = range(7)


def _leaky(x):
    return jnp.where(x > 0, x, LEAKY_SLOPE * x)


def shape_embedding_kernel(pose_ref, a_ref, pool_ref,
                           w1_ref, w2_ref, wfcg1_ref, wg2_ref, bias_ref,
                           out_ref):
    H = w2_ref.shape[1]
    C1 = wfcg1_ref.shape[1]
    ND = wg2_ref.shape[1]

    x = pose_ref[0]            # [gb*N, P]      nodes of all graphs in this chunk
    a = a_ref[0]               # [gb*N, gb*N]   block-diagonal normalized adjacency
    pool = pool_ref[...]       # [gb, gb*N]     per-graph 0/1 pooling selector
    bias = bias_ref[...]       # [8, 128]       packed row vectors

    # ---- RefineNetwork: PositionEmbedding (2-layer MLP); fc is folded into wg1 ----
    h = _leaky(jnp.dot(x, w1_ref[...], preferred_element_type=jnp.float32)
               + bias[_ROW_B1:_ROW_B1 + 1, :])
    h = _leaky(jnp.dot(h, w2_ref[...], preferred_element_type=jnp.float32)
               + bias[_ROW_B2:_ROW_B2 + 1, :H])

    # ---- GCNConv 1: leaky( A_hat @ (h @ (wfc@wg1) + bfc@wg1) + bg1 ) ----
    t = jnp.dot(h, wfcg1_ref[...], preferred_element_type=jnp.float32) \
        + bias[_ROW_BFCG1:_ROW_BFCG1 + 1, :C1]
    g = _leaky(jnp.dot(a, t, preferred_element_type=jnp.float32)
               + bias[_ROW_BG1:_ROW_BG1 + 1, :C1])

    # ---- GCNConv 2 ----
    g = jnp.dot(g, wg2_ref[...], preferred_element_type=jnp.float32)
    g = _leaky(jnp.dot(a, g, preferred_element_type=jnp.float32)
               + bias[_ROW_BG2:_ROW_BG2 + 1, :ND])

    # ---- per-graph mean pool + BatchNorm (eval), folded: out = (sel@g)*scale + shift ----
    pooled = jnp.dot(pool, g, preferred_element_type=jnp.float32)   # [gb, ND] (sums)
    out_ref[0] = pooled * bias[_ROW_SCALE:_ROW_SCALE + 1, :ND] \
        + bias[_ROW_SHIFT:_ROW_SHIFT + 1, :ND]


def build_normalized_adjacency(edge_index, num_nodes):
    """Dense A_hat = D^-1/2 (A + I) D^-1/2 matching PyG GCNConv gcn_norm.
    Topology-dependent; call once per graph and cache (hoisted out of the hot path)."""
    src, dst = edge_index[0], edge_index[1]
    a = jnp.zeros((num_nodes, num_nodes), jnp.float32)
    a = a.at[dst, src].add(1.0)          # A[i, j] = 1 for edge j -> i
    a = a + jnp.eye(num_nodes, dtype=jnp.float32)
    deg = a.sum(axis=1)
    d_inv_sqrt = jax.lax.rsqrt(deg)
    return d_inv_sqrt[:, None] * a * d_inv_sqrt[None, :]


def fold_params(params, n_nodes):
    """Host-side algebraic folding: fc->wg1, BatchNorm+1/N -> (scale, shift),
    and pack all row vectors into one zero-padded [8,128] operand."""
    wfc_g1 = params["wfc"] @ params["wg1"]                       # [H, C1]
    bfc_g1 = params["bfc"] @ params["wg1"]                       # [1, C1]

    inv_std = jax.lax.rsqrt(params["bn_var"] + BN_EPS)
    scale = params["bn_gamma"] * inv_std / float(n_nodes)        # includes 1/N of mean-pool
    shift = params["bn_beta"] - params["bn_mean"] * params["bn_gamma"] * inv_std

    bias_pack = jnp.zeros((8, 128), jnp.float32)

    def put(bp, row, v):
        v = v.reshape(-1)
        assert v.shape[0] <= 128, "packed row vector exceeds one vreg lane row"
        return bp.at[row, :v.shape[0]].set(v)

    bias_pack = put(bias_pack, _ROW_B1, params["b1"])
    bias_pack = put(bias_pack, _ROW_B2, params["b2"])
    bias_pack = put(bias_pack, _ROW_BFCG1, bfc_g1)
    bias_pack = put(bias_pack, _ROW_BG1, params["bg1"])
    bias_pack = put(bias_pack, _ROW_BG2, params["bg2"])
    bias_pack = put(bias_pack, _ROW_SCALE, scale)
    bias_pack = put(bias_pack, _ROW_SHIFT, shift)

    return dict(w1=params["w1"], w2=params["w2"],
                wfc_g1=wfc_g1, wg2=params["wg2"], bias=bias_pack)


def shape_embedding_forward(pose, a_hat, folded, graphs_per_block=None):
    """pose: [B, N, P], a_hat: [B, N, N] (precomputed normalized adjacency per graph)."""
    B, N, P = pose.shape
    n_dim = folded["wg2"].shape[1]

    # Pick how many graphs to fuse per grid step: aim for ~128 MXU rows per chunk.
    if graphs_per_block is None:
        graphs_per_block = max(1, min(B, max(1, 128 // N)))
    gb = graphs_per_block
    num_chunks = -(-B // gb)
    b_pad = num_chunks * gb

    pose = pose.astype(jnp.float32)
    a_hat = a_hat.astype(jnp.float32)
    if b_pad != B:   # pad batch; padded graphs are sliced off after the kernel
        pad = b_pad - B
        pose = jnp.concatenate([pose, jnp.zeros((pad, N, P), jnp.float32)], axis=0)
        a_hat = jnp.concatenate([a_hat, jnp.zeros((pad, N, N), jnp.float32)], axis=0)

    # Stack the gb graphs of each chunk along the node axis: [num_chunks, gb*N, P]
    pose_c = pose.reshape(num_chunks, gb * N, P)

    # Block-diagonal normalized adjacency per chunk: [num_chunks, gb*N, gb*N]
    a4 = a_hat.reshape(num_chunks, gb, N, N)
    a_blk = jnp.zeros((num_chunks, gb * N, gb * N), jnp.float32)
    for b in range(gb):
        a_blk = a_blk.at[:, b * N:(b + 1) * N, b * N:(b + 1) * N].set(a4[:, b])

    # 0/1 per-graph pooling selector (the 1/N of the mean is folded into BN scale)
    pool = jnp.kron(jnp.eye(gb, dtype=jnp.float32),
                    jnp.ones((1, N), jnp.float32))                  # [gb, gb*N]

    in_specs = [
        pl.BlockSpec((1, gb * N, P), lambda i: (i, 0, 0)),           # chunked pose
        pl.BlockSpec((1, gb * N, gb * N), lambda i: (i, 0, 0)),      # chunked A_hat (block-diag)
        pl.BlockSpec((gb, gb * N), lambda i: (0, 0)),                # pooling selector (resident)
        pl.BlockSpec(folded["w1"].shape, lambda i: (0, 0)),          # weights: constant block ->
        pl.BlockSpec(folded["w2"].shape, lambda i: (0, 0)),          # stay VMEM-resident
        pl.BlockSpec(folded["wfc_g1"].shape, lambda i: (0, 0)),
        pl.BlockSpec(folded["wg2"].shape, lambda i: (0, 0)),
        pl.BlockSpec((8, 128), lambda i: (0, 0)),                    # packed biases / BN
    ]
    out_specs = pl.BlockSpec((1, gb, n_dim), lambda i: (i, 0, 0))

    out = pl.pallas_call(
        shape_embedding_kernel,
        out_shape=jax.ShapeDtypeStruct((num_chunks, gb, n_dim), jnp.float32),
        grid=(num_chunks,),
        in_specs=in_specs,
        out_specs=out_specs,
        compiler_params=pltpu.CompilerParams(dimension_semantics=("parallel",)),
    )(pose_c, a_blk, pool,
      folded["w1"], folded["w2"], folded["wfc_g1"], folded["wg2"], folded["bias"])

    return out.reshape(b_pad, n_dim)[:B]


def reference_forward_single(pose, a_hat, params):
    """Pure-JAX reference of the original (unfolded) module, single graph, eval-mode BN."""
    hp = jax.lax.Precision.HIGHEST
    h = _leaky(jnp.dot(pose, params["w1"], precision=hp) + params["b1"])
    h = _leaky(jnp.dot(h, params["w2"], precision=hp) + params["b2"])
    y = jnp.dot(h, params["wfc"], precision=hp) + params["bfc"]
    g = _leaky(jnp.dot(a_hat, jnp.dot(y, params["wg1"], precision=hp), precision=hp)
               + params["bg1"])
    g = _leaky(jnp.dot(a_hat, jnp.dot(g, params["wg2"], precision=hp), precision=hp)
               + params["bg2"])
    pooled = jnp.mean(g, axis=0, keepdims=True)
    inv_std = jax.lax.rsqrt(params["bn_var"] + BN_EPS)
    return ((pooled - params["bn_mean"]) * inv_std * params["bn_gamma"]
            + params["bn_beta"])[0]


def init_params(key, pose_n_features, n_hidden, out_features, relation_layers):
    assert out_features == relation_layers[0][0]
    ks = jax.random.split(key, 8)

    def linear(k, fan_in, fan_out):
        bound = 1.0 / jnp.sqrt(fan_in)
        kw, kb = jax.random.split(k)
        w = jax.random.uniform(kw, (fan_in, fan_out), jnp.float32, -bound, bound)
        b = jax.random.uniform(kb, (1, fan_out), jnp.float32, -bound, bound)
        return w, b

    def glorot(k, fan_in, fan_out):
        bound = jnp.sqrt(6.0 / (fan_in + fan_out))
        return jax.random.uniform(k, (fan_in, fan_out), jnp.float32, -bound, bound)

    w1, b1 = linear(ks[0], pose_n_features, 128)
    w2, b2 = linear(ks[1], 128, n_hidden)
    wfc, bfc = linear(ks[2], n_hidden, out_features)

    (c1_in, c1_out), (c2_in, c2_out) = relation_layers
    wg1 = glorot(ks[3], c1_in, c1_out)
    bg1 = jnp.zeros((1, c1_out), jnp.float32)
    wg2 = glorot(ks[4], c2_in, c2_out)
    bg2 = jnp.zeros((1, c2_out), jnp.float32)

    n_dim = c2_out
    bn_gamma = (1.0 + 0.02 * jax.random.normal(ks[5], (1, n_dim))).astype(jnp.float32)
    bn_beta = jnp.zeros((1, n_dim), jnp.float32)
    bn_mean = jnp.zeros((1, n_dim), jnp.float32)   # running stats (eval mode)
    bn_var = jnp.ones((1, n_dim), jnp.float32)
    # TODO(synk): training-mode BatchNorm (batch statistics over the graph batch) is not
    # implemented in-kernel; eval-mode running stats are folded into (scale, shift).

    return dict(w1=w1, b1=b1, w2=w2, b2=b2, wfc=wfc, bfc=bfc,
                wg1=wg1, bg1=bg1, wg2=wg2, bg2=bg2,
                bn_gamma=bn_gamma, bn_beta=bn_beta, bn_mean=bn_mean, bn_var=bn_var)


if __name__ == "__main__":
    key = jax.random.PRNGKey(0)
    k_pose, k_param = jax.random.split(key)

    B = 2
    N_NODES = 16
    POSE_N_FEATURES = 8
    N_HIDDEN = 32
    OUT_FEATURES = 16
    RELATION_LAYERS = [(16, 32), (32, 8)]

    poses = jax.random.normal(k_pose, (B, N_NODES, POSE_N_FEATURES), jnp.float32)

    # graph 0: bidirectional ring
    src = jnp.arange(N_NODES, dtype=jnp.int32)
    dst = (src + 1) % N_NODES
    ei_ring = jnp.stack([jnp.concatenate([src, dst]),
                         jnp.concatenate([dst, src])], axis=0)
    # graph 1: bidirectional star centered at node 0
    leaves = jnp.arange(1, N_NODES, dtype=jnp.int32)
    center = jnp.zeros_like(leaves)
    ei_star = jnp.stack([jnp.concatenate([center, leaves]),
                         jnp.concatenate([leaves, center])], axis=0)

    # adjacency precomputed once per topology (hoisted out of the per-call path)
    a_hat = jnp.stack([build_normalized_adjacency(ei_ring, N_NODES),
                       build_normalized_adjacency(ei_star, N_NODES)], axis=0)

    params = init_params(k_param, POSE_N_FEATURES, N_HIDDEN, OUT_FEATURES, RELATION_LAYERS)
    folded = fold_params(params, N_NODES)

    out = shape_embedding_forward(poses, a_hat, folded)
    out = jax.block_until_ready(out)

    ref = jax.vmap(lambda p, a: reference_forward_single(p, a, params))(poses, a_hat)
    assert out.shape == (B, RELATION_LAYERS[-1][-1])
    assert jnp.allclose(out, ref, atol=2e-3, rtol=2e-3), (out, ref)
    print("KERNEL_OK")
</pallas_src>

<mosaic_0001>
module attributes {stable_mosaic.version = 11 : i64} {
  func.func @shape_embedding_kernel(%arg0: i32, %arg1: memref<1x32x8xf32, #tpu.memory_space<vmem>>, %arg2: memref<1x32x32xf32, #tpu.memory_space<vmem>>, %arg3: memref<2x32xf32, #tpu.memory_space<vmem>>, %arg4: memref<8x128xf32, #tpu.memory_space<vmem>>, %arg5: memref<128x32xf32, #tpu.memory_space<vmem>>, %arg6: memref<32x32xf32, #tpu.memory_space<vmem>>, %arg7: memref<32x8xf32, #tpu.memory_space<vmem>>, %arg8: memref<8x128xf32, #tpu.memory_space<vmem>>, %arg9: memref<1x2x8xf32, #tpu.memory_space<vmem>>) attributes {dimension_semantics = [#tpu.dimension_semantics<parallel>], iteration_bounds = array<i64: 1>, scalar_prefetch = 0 : i64, scratch_operands = 0 : i64, tpu.core_type = #tpu.core_type<tc>, window_params = [{transform_indices = @transform_0, window_bounds = array<i64: 1, 32, 8>}, {transform_indices = @transform_1, window_bounds = array<i64: 1, 32, 32>}, {pipeline_mode = #tpu.pipeline_mode<synchronous>, transform_indices = @transform_2, window_bounds = array<i64: 2, 32>}, {pipeline_mode = #tpu.pipeline_mode<synchronous>, transform_indices = @transform_3, window_bounds = array<i64: 8, 128>}, {pipeline_mode = #tpu.pipeline_mode<synchronous>, transform_indices = @transform_4, window_bounds = array<i64: 128, 32>}, {pipeline_mode = #tpu.pipeline_mode<synchronous>, transform_indices = @transform_5, window_bounds = array<i64: 32, 32>}, {pipeline_mode = #tpu.pipeline_mode<synchronous>, transform_indices = @transform_6, window_bounds = array<i64: 32, 8>}, {pipeline_mode = #tpu.pipeline_mode<synchronous>, transform_indices = @transform_7, window_bounds = array<i64: 8, 128>}, {transform_indices = @transform_8, window_bounds = array<i64: 1, 2, 8>}]} {
    %c0 = arith.constant 0 : index
    %c0_0 = arith.constant 0 : index
    %c0_1 = arith.constant 0 : index
    %0 = vector.load %arg1[%c0, %c0_0, %c0_1] : memref<1x32x8xf32, #tpu.memory_space<vmem>>, vector<1x32x8xf32>
    %1 = vector.shape_cast %0 : vector<1x32x8xf32> to vector<32x8xf32>
    %c0_2 = arith.constant 0 : index
    %c0_3 = arith.constant 0 : index
    %c0_4 = arith.constant 0 : index
    %2 = vector.load %arg2[%c0_2, %c0_3, %c0_4] : memref<1x32x32xf32, #tpu.memory_space<vmem>>, vector<1x32x32xf32>
    %3 = vector.shape_cast %2 : vector<1x32x32xf32> to vector<32x32xf32>
    %c0_5 = arith.constant 0 : index
    %c0_6 = arith.constant 0 : index
    %4 = vector.load %arg3[%c0_5, %c0_6] : memref<2x32xf32, #tpu.memory_space<vmem>>, vector<2x32xf32>
    %c0_7 = arith.constant 0 : index
    %c0_8 = arith.constant 0 : index
    %5 = vector.load %arg8[%c0_7, %c0_8] : memref<8x128xf32, #tpu.memory_space<vmem>>, vector<8x128xf32>
    %c0_9 = arith.constant 0 : index
    %c0_10 = arith.constant 0 : index
    %6 = vector.load %arg4[%c0_9, %c0_10] : memref<8x128xf32, #tpu.memory_space<vmem>>, vector<8x128xf32>
    %cst = arith.constant dense<0.000000e+00> : vector<32x128xf32>
    %7 = tpu.matmul %1, %6, %cst {dimension_numbers = #tpu.dot_dimension_numbers<[1], [0], [0], [1], [0, 0, 1, 1], [], []>} : vector<32x8xf32>, vector<8x128xf32>, vector<32x128xf32> -> vector<32x128xf32>
    %8 = vector.extract_strided_slice %5 {offsets = [0, 0], sizes = [1, 128], strides = [1, 1]} : vector<8x128xf32> to vector<1x128xf32>
    %9 = vector.broadcast %8 : vector<1x128xf32> to vector<32x128xf32>
    %10 = arith.addf %7, %9 : vector<32x128xf32>
    %cst_11 = arith.constant 0.000000e+00 : f32
    %11 = vector.broadcast %cst_11 : f32 to vector<32x128xf32>
    %12 = arith.cmpf ogt, %10, %11 : vector<32x128xf32>
    %cst_12 = arith.constant 0.00999999977 : f32
    %13 = vector.broadcast %cst_12 : f32 to vector<32x128xf32>
    %14 = arith.mulf %13, %10 : vector<32x128xf32>
    %15 = arith.select %12, %10, %14 : vector<32x128xi1>, vector<32x128xf32>
    %c0_13 = arith.constant 0 : index
    %c0_14 = arith.constant 0 : index
    %16 = vector.load %arg5[%c0_13, %c0_14] : memref<128x32xf32, #tpu.memory_space<vmem>>, vector<128x32xf32>
    %cst_15 = arith.constant dense<0.000000e+00> : vector<32x32xf32>
    %17 = tpu.matmul %15, %16, %cst_15 {dimension_numbers = #tpu.dot_dimension_numbers<[1], [0], [0], [1], [0, 0, 1, 1], [], []>} : vector<32x128xf32>, vector<128x32xf32>, vector<32x32xf32> -> vector<32x32xf32>
    %18 = vector.extract_strided_slice %5 {offsets = [1, 0], sizes = [1, 32], strides = [1, 1]} : vector<8x128xf32> to vector<1x32xf32>
    %19 = vector.broadcast %18 : vector<1x32xf32> to vector<32x32xf32>
    %20 = arith.addf %17, %19 : vector<32x32xf32>
    %cst_16 = arith.constant 0.000000e+00 : f32
    %21 = vector.broadcast %cst_16 : f32 to vector<32x32xf32>
    %22 = arith.cmpf ogt, %20, %21 : vector<32x32xf32>
    %cst_17 = arith.constant 0.00999999977 : f32
    %23 = vector.broadcast %cst_17 : f32 to vector<32x32xf32>
    %24 = arith.mulf %23, %20 : vector<32x32xf32>
    %25 = arith.select %22, %20, %24 : vector<32x32xi1>, vector<32x32xf32>
    %c0_18 = arith.constant 0 : index
    %c0_19 = arith.constant 0 : index
    %26 = vector.load %arg6[%c0_18, %c0_19] : memref<32x32xf32, #tpu.memory_space<vmem>>, vector<32x32xf32>
    %cst_20 = arith.constant dense<0.000000e+00> : vector<32x32xf32>
    %27 = tpu.matmul %25, %26, %cst_20 {dimension_numbers = #tpu.dot_dimension_numbers<[1], [0], [0], [1], [0, 0, 1, 1], [], []>} : vector<32x32xf32>, vector<32x32xf32>, vector<32x32xf32> -> vector<32x32xf32>
    %28 = vector.extract_strided_slice %5 {offsets = [2, 0], sizes = [1, 32], strides = [1, 1]} : vector<8x128xf32> to vector<1x32xf32>
    %29 = vector.broadcast %28 : vector<1x32xf32> to vector<32x32xf32>
    %30 = arith.addf %27, %29 : vector<32x32xf32>
    %cst_21 = arith.constant dense<0.000000e+00> : vector<32x32xf32>
    %31 = tpu.matmul %3, %30, %cst_21 {dimension_numbers = #tpu.dot_dimension_numbers<[1], [0], [0], [1], [0, 0, 1, 1], [], []>} : vector<32x32xf32>, vector<32x32xf32>, vector<32x32xf32> -> vector<32x32xf32>
    %32 = vector.extract_strided_slice %5 {offsets = [3, 0], sizes = [1, 32], strides = [1, 1]} : vector<8x128xf32> to vector<1x32xf32>
    %33 = vector.broadcast %32 : vector<1x32xf32> to vector<32x32xf32>
    %34 = arith.addf %31, %33 : vector<32x32xf32>
    %cst_22 = arith.constant 0.000000e+00 : f32
    %35 = vector.broadcast %cst_22 : f32 to vector<32x32xf32>
    %36 = arith.cmpf ogt, %34, %35 : vector<32x32xf32>
    %cst_23 = arith.constant 0.00999999977 : f32
    %37 = vector.broadcast %cst_23 : f32 to vector<32x32xf32>
    %38 = arith.mulf %37, %34 : vector<32x32xf32>
    %39 = arith.select %36, %34, %38 : vector<32x32xi1>, vector<32x32xf32>
    %c0_24 = arith.constant 0 : index
    %c0_25 = arith.constant 0 : index
    %40 = vector.load %arg7[%c0_24, %c0_25] : memref<32x8xf32, #tpu.memory_space<vmem>>, vector<32x8xf32>
    %cst_26 = arith.constant dense<0.000000e+00> : vector<32x8xf32>
    %41 = tpu.matmul %39, %40, %cst_26 {dimension_numbers = #tpu.dot_dimension_numbers<[1], [0], [0], [1], [0, 0, 1, 1], [], []>} : vector<32x32xf32>, vector<32x8xf32>, vector<32x8xf32> -> vector<32x8xf32>
    %cst_27 = arith.constant dense<0.000000e+00> : vector<32x8xf32>
    %42 = tpu.matmul %3, %41, %cst_27 {dimension_numbers = #tpu.dot_dimension_numbers<[1], [0], [0], [1], [0, 0, 1, 1], [], []>} : vector<32x32xf32>, vector<32x8xf32>, vector<32x8xf32> -> vector<32x8xf32>
    %43 = vector.extract_strided_slice %5 {offsets = [4, 0], sizes = [1, 8], strides = [1, 1]} : vector<8x128xf32> to vector<1x8xf32>
    %44 = vector.broadcast %43 : vector<1x8xf32> to vector<32x8xf32>
    %45 = arith.addf %42, %44 : vector<32x8xf32>
    %cst_28 = arith.constant 0.000000e+00 : f32
    %46 = vector.broadcast %cst_28 : f32 to vector<32x8xf32>
    %47 = arith.cmpf ogt, %45, %46 : vector<32x8xf32>
    %cst_29 = arith.constant 0.00999999977 : f32
    %48 = vector.broadcast %cst_29 : f32 to vector<32x8xf32>
    %49 = arith.mulf %48, %45 : vector<32x8xf32>
    %50 = arith.select %47, %45, %49 : vector<32x8xi1>, vector<32x8xf32>
    %cst_30 = arith.constant dense<0.000000e+00> : vector<2x8xf32>
    %51 = tpu.matmul %4, %50, %cst_30 {dimension_numbers = #tpu.dot_dimension_numbers<[1], [0], [0], [1], [0, 0, 1, 1], [], []>} : vector<2x32xf32>, vector<32x8xf32>, vector<2x8xf32> -> vector<2x8xf32>
    %52 = vector.extract_strided_slice %5 {offsets = [5, 0], sizes = [1, 8], strides = [1, 1]} : vector<8x128xf32> to vector<1x8xf32>
    %53 = vector.broadcast %52 : vector<1x8xf32> to vector<2x8xf32>
    %54 = arith.mulf %51, %53 : vector<2x8xf32>
    %55 = vector.extract_strided_slice %5 {offsets = [6, 0], sizes = [1, 8], strides = [1, 1]} : vector<8x128xf32> to vector<1x8xf32>
    %56 = vector.broadcast %55 : vector<1x8xf32> to vector<2x8xf32>
    %57 = arith.addf %54, %56 : vector<2x8xf32>
    %c0_31 = arith.constant 0 : index
    %c0_32 = arith.constant 0 : index
    %c0_33 = arith.constant 0 : index
    %58 = vector.load %arg9[%c0_31, %c0_32, %c0_33] : memref<1x2x8xf32, #tpu.memory_space<vmem>>, vector<1x2x8xf32>
    %59 = vector.shape_cast %58 : vector<1x2x8xf32> to vector<2x8xf32>
    %60 = vector.shape_cast %57 : vector<2x8xf32> to vector<1x2x8xf32>
    tpu.vector_store %arg9[%c0_31, %c0_32, %c0_33], %60 {strides = array<i32>} : memref<1x2x8xf32, #tpu.memory_space<vmem>>, vector<1x2x8xf32>,
    return
  }
  func.func @transform_0(%arg0: i32) -> (i32, i32, i32) {
    %c0_i32 = arith.constant 0 : i32
    %c0_i32_0 = arith.constant 0 : i32
    %c0_i32_1 = arith.constant 0 : i32
    return %arg0, %c0_i32, %c0_i32_0 : i32, i32, i32
  }
  func.func @transform_1(%arg0: i32) -> (i32, i32, i32) {
    %c0_i32 = arith.constant 0 : i32
    %c0_i32_0 = arith.constant 0 : i32
    %c0_i32_1 = arith.constant 0 : i32
    return %arg0, %c0_i32, %c0_i32_0 : i32, i32, i32
  }
  func.func @transform_2(%arg0: i32) -> (i32, i32) {
    %c0_i32 = arith.constant 0 : i32
    %c0_i32_0 = arith.constant 0 : i32
    %c0_i32_1 = arith.constant 0 : i32
    return %c0_i32, %c0_i32_0 : i32, i32
  }
  func.func @transform_3(%arg0: i32) -> (i32, i32) {
    %c0_i32 = arith.constant 0 : i32
    %c0_i32_0 = arith.constant 0 : i32
    %c0_i32_1 = arith.constant 0 : i32
    return %c0_i32, %c0_i32_0 : i32, i32
  }
  func.func @transform_4(%arg0: i32) -> (i32, i32) {
    %c0_i32 = arith.constant 0 : i32
    %c0_i32_0 = arith.constant 0 : i32
    %c0_i32_1 = arith.constant 0 : i32
    return %c0_i32, %c0_i32_0 : i32, i32
  }
  func.func @transform_5(%arg0: i32) -> (i32, i32) {
    %c0_i32 = arith.constant 0 : i32
    %c0_i32_0 = arith.constant 0 : i32
    %c0_i32_1 = arith.constant 0 : i32
    return %c0_i32, %c0_i32_0 : i32, i32
  }
  func.func @transform_6(%arg0: i32) -> (i32, i32) {
    %c0_i32 = arith.constant 0 : i32
    %c0_i32_0 = arith.constant 0 : i32
    %c0_i32_1 = arith.constant 0 : i32
    return %c0_i32, %c0_i32_0 : i32, i32
  }
  func.func @transform_7(%arg0: i32) -> (i32, i32) {
    %c0_i32 = arith.constant 0 : i32
    %c0_i32_0 = arith.constant 0 : i32
    %c0_i32_1 = arith.constant 0 : i32
    return %c0_i32, %c0_i32_0 : i32, i32
  }
  func.func @transform_8(%arg0: i32) -> (i32, i32, i32) {
    %c0_i32 = arith.constant 0 : i32
    %c0_i32_0 = arith.constant 0 : i32
    %c0_i32_1 = arith.constant 0 : i32
    return %arg0, %c0_i32, %c0_i32_0 : i32, i32, i32
  }
}

</mosaic_0001>

<bundles_post_ra>
// kernel: tpu_custom_call.1
= control target key start
LH: loop header
LB: loop body
LE: loop exit
PB: predicated region body
PF: predicated region fallthrough
CT: control target
= control target key end

     0   :  { %vm45_vm0 = vcmask 64512   ;;  %s1212_s0 = inlined_call_operand.vmem [shape: f32[1,32,8], index: 0, kind: input, shape index: {}]   ;;  %s1213_s1 = inlined_call_operand.vmem [shape: f32[1,32,32], index: 1, kind: input, shape index: {}]   ;;  %s1214_s2 = inlined_call_operand.vmem [shape: f32[2,32], index: 2, kind: input, shape index: {}]   ;;  %s1215_s3 = inlined_call_operand.vmem [shape: f32[8,128], index: 3, kind: input, shape index: {}]   ;;  %s1216_s4 = inlined_call_operand.vmem [shape: f32[128,32], index: 4, kind: input, shape index: {}]   ;;  %s1217_s5 = inlined_call_operand.vmem [shape: f32[32,32], index: 5, kind: input, shape index: {}]   ;;  %s1218_s6 = inlined_call_operand.vmem [shape: f32[32,8], index: 6, kind: input, shape index: {}]   ;;  %s1219_s7 = inlined_call_operand.vmem [shape: f32[8,128], index: 7, kind: input, shape index: {}]   ;;  %s1220_s8 = inlined_call_operand.hbm [shape: f32[1,2,8], index: 8, kind: output, shape index: {}]  }
   0x1   :  { %v40_v0 = vld [vmem:[%s1215_s3] sm:$0xff]  ;;  %v31_v2 = vld [vmem:[%s1212_s0 + $0x8] sm:$0xff]  ;;  %v32_v3 = vld [vmem:[%s1212_s0 + $0x10] sm:$0xff] }
   0x2   :  { %v30_v1 = vld [vmem:[%s1212_s0] sm:$0xff]  ;;  %875 = vmatprep.subr.mxu0 %v40_v0  ;;  %v170_v4 = vld [vmem:[%s1216_s4 + $0x78] sm:$0xff]  ;;  %v169_v5 = vld [vmem:[%s1216_s4 + $0x70] sm:$0xff] }
   0x3   :  { %877 = vmatprep.mubr.msk.f32.mxu0 %vm45_vm0, %v30_v1  ;;  %876 = vmatpush3.msra.mxu0 %v40_v0  ;;  %v168_v6 = vld [vmem:[%s1216_s4 + $0x68] sm:$0xff]  ;;  %v33_v7 = vld [vmem:[%s1212_s0 + $0x18] sm:$0xff]  ;;  %v167_v8 = vld [vmem:[%s1216_s4 + $0x60] sm:$0xff] }
   0x4   :  { %883 = vmatprep.subr.mxu1 %v170_v4  ;;  %878 = vmatmul.mubr.msk.f32.vlgmr.msra.gmra.mxu0 %vm45_vm0, %v31_v2 }
   0x5   :  { %884 = vmatpush3.msra.mxu1 %v170_v4  ;;  %880 = vmatprep.mubr.msk.f32.mxu0 %vm45_vm0, %v32_v3 }
   0x6   :  { %885 = vmatprep.subr.mxu1 %v169_v5 }
   0x7   :  { %886 = vmatpush3.msra.mxu1 %v169_v5 }
   0x8   :  { %887 = vmatprep.subr.mxu1 %v168_v6 }
   0x9   :  { %13 = vsyncpa [#allocation3], 0  ;;  %881 = vmatmul.mubr.msk.f32.gmra.mxu0 %vm45_vm0, %v33_v7  ;;  %888 = vmatpush3.msra.mxu1 %v168_v6  ;;  %v166_v9 = vld [vmem:[%s1216_s4 + $0x58] sm:$0xff]  ;;  %v165_v10 = vld [vmem:[%s1216_s4 + $0x50] sm:$0xff]  ;;  %v41_v21 = vlaneseq  ;;  %vm280_vm5 = vcmask 261120   ;;  %vm1014_vm14 = vmmov 0  }
   0xa   :  { %889 = vmatprep.subr.mxu1 %v167_v8  ;;  %v164_v11 = vld [vmem:[%s1216_s4 + $0x48] sm:$0xff]  ;;  %v163_v12 = vld [vmem:[%s1216_s4 + $0x40] sm:$0xff]  ;;  %v162_v13 = vld [vmem:[%s1216_s4 + $0x38] sm:$0xff]  ;;  %s1015_s21 = smov [#allocation2]  }
   0xb   :  { %890 = vmatpush3.msra.mxu1 %v167_v8  ;;  %v161_v14 = vld [vmem:[%s1216_s4 + $0x30] sm:$0xff]  ;;  %v160_v15 = vld [vmem:[%s1216_s4 + $0x28] sm:$0xff]  ;;  %v159_v16 = vld [vmem:[%s1216_s4 + $0x20] sm:$0xff]  ;;  %v1128_v22 = vshrl.u32 %v41_v21, 7  ;;  %s784_s22 = sshll.u32 %s1015_s21, 4  ;;  %s785_s22 = int_to_ptr.vmem [resolvable:$true] %s784_s22 }
   0xc   :  { %891 = vmatprep.subr.mxu1 %v166_v9  ;;  %v158_v17 = vld [vmem:[%s1216_s4 + $0x18] sm:$0xff]  ;;  %v157_v18 = vld [vmem:[%s1216_s4 + $0x10] sm:$0xff]  ;;  %v156_v19 = vld [vmem:[%s1216_s4 + $0x8] sm:$0xff]  ;;  %p996_p1 = scmp.lt.s32.totalorder %s785_s22, %s785_s22 }
   0xd   :  { %892 = vmatpush3.msra.mxu1 %v166_v9  ;;  %v155_v20 = vld [vmem:[%s1216_s4] sm:$0xff]  ;;  %v43_v23 = vsub.s32 0, %v1128_v22  ;;  %v275_v42 = vld [vmem:[%s1217_s5 + $0x18] sm:$0xff]  ;;  %v274_v43 = vld [vmem:[%s1217_s5 + $0x10] sm:$0xff]  ;;  %v173_v46 = vsub.s32 1, %v1128_v22  ;;  %v278_v1 = vsub.s32 2, %v1128_v22 }
   0xe   :  { %893 = vmatprep.subr.mxu1 %v165_v10  ;;  %v1134_v24 = vld [vmem:[%s1219_s7] sm:$0xff]  ;;  %921 = vmatprep.subr.mxu0 %v275_v42  ;;  %v273_v44 = vld [vmem:[%s1217_s5 + $0x8] sm:$0xff] }
   0xf   :  { %894 = vmatpush3.msra.mxu1 %v165_v10  ;;  %v44_v25 = vrot.slane %v1134_v24, %v43_v23  ;;  %922 = vmatpush3.msra.mxu0 %v275_v42  ;;  %v272_v45 = vld [vmem:[%s1217_s5] sm:$0xff]  ;;  %v174_v47 = vrot.slane %v1134_v24, %v173_v46  ;;  %v279_v4 = vrot.slane %v1134_v24, %v278_v1  ;;  %v1013_v42 = vmov 0.0  }
  0x10   :  { %895 = vmatprep.subr.mxu1 %v164_v11  ;;  %923 = vmatprep.subr.mxu0 %v274_v43  ;;  %v1158_v0 = vld [vmem:[%s1213_s1] sm:$0xff] }
  0x11   :  { %896 = vmatpush3.msra.mxu1 %v164_v11  ;;  %924 = vmatpush3.msra.mxu0 %v274_v43  ;;  %v35_v11 = vld [vmem:[%s1213_s1 + $0x8] sm:$0xff]  ;;  %v594_v43 = vsub.s32 4, %v1128_v22 }
  0x12   :  { %897 = vmatprep.subr.mxu1 %v163_v12  ;;  %925 = vmatprep.subr.mxu0 %v273_v44 }
  0x13   :  { %898 = vmatpush3.msra.mxu1 %v163_v12  ;;  %926 = vmatpush3.msra.mxu0 %v273_v44  ;;  %v36_v12 = vld [vmem:[%s1213_s1 + $0x10] sm:$0xff] }
  0x14   :  { %899 = vmatprep.subr.mxu1 %v162_v13  ;;  %927 = vmatprep.subr.mxu0 %v272_v45 }
  0x15   :  { %900 = vmatpush3.msra.mxu1 %v162_v13  ;;  %928 = vmatpush3.msra.mxu0 %v272_v45  ;;  %v37_v13 = vld [vmem:[%s1213_s1 + $0x18] sm:$0xff]  ;;  %v595_v45 = vrot.slane %v1134_v24, %v594_v43 }
  0x16   :  { %901 = vmatprep.subr.mxu1 %v161_v14 }
  0x17   :  { %902 = vmatpush3.msra.mxu1 %v161_v14  ;;  %v494_v14 = vld [vmem:[%s1218_s6 + $0x18] sm:$0xff] }
  0x18   :  { %903 = vmatprep.subr.mxu1 %v160_v15 }
  0x19   :  { %904 = vmatpush3.msra.mxu1 %v160_v15  ;;  %v493_v15 = vld [vmem:[%s1218_s6 + $0x10] sm:$0xff] }
  0x1a   :  { %905 = vmatprep.subr.mxu1 %v159_v16 }
  0x1b   :  { %906 = vmatpush3.msra.mxu1 %v159_v16  ;;  %v492_v16 = vld [vmem:[%s1218_s6 + $0x8] sm:$0xff] }
  0x1c   :  { %907 = vmatprep.subr.mxu1 %v158_v17 }
  0x1d   :  { %908 = vmatpush3.msra.mxu1 %v158_v17  ;;  %v491_v17 = vld [vmem:[%s1218_s6] sm:$0xff] }
  0x1e   :  { %909 = vmatprep.subr.mxu1 %v157_v18 }
  0x1f   :  { %910 = vmatpush3.msra.mxu1 %v157_v18  ;;  %v380_v18 = vsub.s32 3, %v1128_v22 }
  0x20   :  { %911 = vmatprep.subr.mxu1 %v156_v19 }
  0x21   :  { %912 = vmatpush3.msra.mxu1 %v156_v19  ;;  %v381_v19 = vrot.slane %v1134_v24, %v380_v18 }
  0x22   :  { %913 = vmatprep.subr.mxu1 %v155_v20 }
  0x23   :  { %914 = vmatpush3.msra.mxu1 %v155_v20 }
  0x24   :  { %977 = vmatprep.subr.mxu1 %v1013_v42 }
  0xc4   :  { %v879_v26 = vpop.f32.mrf.mxu0 }
  0xc5   :  { %v130_v27 = vadd.f32 %v879_v26, %v44_v25 }
  0xc6   :  { %v124_v28 = vpop.f32.mrf.mxu0 }
  0xc7   :  { %v125_v29 = vadd.f32 %v124_v28, %v44_v25  ;;  %v148_v30 = vmul.f32 0.01, %v130_v27  ;;  %vm144_vm2 = vcmp.gt.f32.partialorder %v130_v27, 0.0 }
  0xc9   :  { %v882_v31 = vpop.f32.mrf.mxu0  ;;  %vm143_vm1 = vcmp.gt.f32.partialorder %v125_v29, 0.0  ;;  %v147_v33 = vmul.f32 0.01, %v125_v29  ;;  %v152_v38 = vsel %vm144_vm2, %v130_v27, %v148_v30 }
  0xca   :  { %v140_v32 = vadd.f32 %v882_v31, %v44_v25 }
  0xcb   :  { %v134_v34 = vpop.f32.mrf.mxu0  ;;  %v151_v36 = vsel %vm143_vm1, %v125_v29, %v147_v33 }
  0xcc   :  { %v135_v35 = vadd.f32 %v134_v34, %v44_v25  ;;  %v150_v37 = vmul.f32 0.01, %v140_v32  ;;  %915 = vmatprep.mubr.f32.mxu1 %v151_v36  ;;  %vm146_vm4 = vcmp.gt.f32.partialorder %v140_v32, 0.0 }
  0xcd   :  { %916 = vmatmul.mubr.f32.vlgmr.msra.gmra.mxu1 %v152_v38 }
  0xce   :  { %v149_v39 = vmul.f32 0.01, %v135_v35  ;;  %vm145_vm3 = vcmp.gt.f32.partialorder %v135_v35, 0.0  ;;  %v154_v41 = vsel %vm146_vm4, %v140_v32, %v150_v37 }
  0xd0   :  { %v153_v40 = vsel %vm145_vm3, %v135_v35, %v149_v39  ;;  %vm776_vm3 = vcmask 58368  }
  0xd1   :  { %918 = vmatprep.mubr.f32.mxu1 %v153_v40 }
  0xd2   :  { %919 = vmatmul.mubr.f32.gmra.mxu1 %v154_v41 }
  0xd3   :  { %985 = vmatprep.mubr.msk.f32.mxu1 %vm1014_vm14, %v1013_v42 }
 0x18d   :  { %v917_v48 = vpop.f32.mrf.mxu1 }
 0x18e   :  { %v247_v49 = vadd.f32 %v917_v48, %v174_v47 }
 0x18f   :  { %v241_v50 = vpop.f32.mrf.mxu1 }
 0x190   :  { %v242_v51 = vadd.f32 %v241_v50, %v174_v47  ;;  %v265_v52 = vmul.f32 0.01, %v247_v49  ;;  %vm261_vm6 = vcmp.gt.f32.partialorder %v247_v49, 0.0 }
 0x192   :  { %v920_v53 = vpop.f32.mrf.mxu1  ;;  %vm260_vm7 = vcmp.gt.f32.partialorder %v242_v51, 0.0  ;;  %v264_v54 = vmul.f32 0.01, %v242_v51  ;;  %v269_v59 = vsel %vm261_vm6, %v247_v49, %v265_v52 }
 0x193   :  { %v257_v55 = vadd.f32 %v920_v53, %v174_v47 }
 0x194   :  { %v251_v56 = vpop.f32.mrf.mxu1  ;;  %v268_v58 = vsel %vm260_vm7, %v242_v51, %v264_v54 }
 0x195   :  { %v252_v57 = vadd.f32 %v251_v56, %v174_v47  ;;  %v267_v60 = vmul.f32 0.01, %v257_v55  ;;  %929 = vmatprep.mubr.msk.f32.mxu0 %vm280_vm5, %v268_v58  ;;  %vm263_vm8 = vcmp.gt.f32.partialorder %v257_v55, 0.0 }
 0x196   :  { %930 = vmatmul.mubr.msk.f32.vlgmr.msra.gmra.mxu0 %vm280_vm5, %v269_v59 }
 0x197   :  { %vm262_vm9 = vcmp.gt.f32.partialorder %v252_v57, 0.0  ;;  %v266_v61 = vmul.f32 0.01, %v252_v57  ;;  %v271_v63 = vsel %vm263_vm8, %v257_v55, %v267_v60  ;;  %v38_v60 = vld [vmem:[%s1214_s2] sm:$0x3]  ;;  %s991_s2 = scalar_lea.vmem %s785_s22, 32 }
 0x198   :  { %p992_p0 = scmp.ne.s32.totalorder %s785_s22, %s991_s2  ;;  %p997_p2 = scmp.lt.s32.totalorder %s991_s2, %s991_s2 }
 0x199   :  { %v270_v62 = vsel %vm262_vm9, %v252_v57, %v266_v61 }
 0x19a   :  { %932 = vmatprep.mubr.msk.f32.mxu0 %vm280_vm5, %v270_v62  ;;  %v768_v62 = vsub.s32 5, %v1128_v22  ;;  %p998_p3 = por %p997_p2, %p996_p1 }
 0x19b   :  { %933 = vmatmul.mubr.msk.f32.gmra.mxu0 %vm280_vm5, %v271_v63  ;;  %v773_v63 = vsub.s32 6, %v1128_v22 }
 0x19c   :  { %943 = vmatprep.mubr.msk.f32.mxu0 %vm280_vm5, %v1158_v0  ;;  %p999_p4 = pnand %p998_p3, %p992_p0 }
 0x19d   :  { %v774_v1 = vrot.slane %v1134_v24, %v773_v63 }
 0x256   :  { %v931_v2 = vpop.f32.mrf.mxu0 }
 0x257   :  { %v365_v9 = vadd.f32 %v931_v2, %v279_v4 }
 0x258   :  { %v359_v3 = vpop.f32.mrf.mxu0 }
 0x259   :  { %v360_v10 = vadd.f32 %v359_v3, %v279_v4 }
 0x25b   :  { %v934_v5 = vpop.f32.mrf.mxu0 }
 0x25c   :  { %v375_v6 = vadd.f32 %v934_v5, %v279_v4 }
 0x25d   :  { %v369_v7 = vpop.f32.mrf.mxu0 }
 0x25e   :  { %v370_v8 = vadd.f32 %v369_v7, %v279_v4  ;;  %935 = vmatprep.subr.mxu0 %v375_v6 }
 0x25f   :  { %936 = vmatpush3.msra.mxu0 %v375_v6 }
 0x260   :  { %937 = vmatprep.subr.mxu0 %v370_v8 }
 0x261   :  { %938 = vmatpush3.msra.mxu0 %v370_v8 }
 0x262   :  { %939 = vmatprep.subr.mxu0 %v365_v9 }
 0x263   :  { %940 = vmatpush3.msra.mxu0 %v365_v9 }
 0x264   :  { %941 = vmatprep.subr.mxu0 %v360_v10 }
 0x265   :  { %942 = vmatpush3.msra.mxu0 %v360_v10 }
 0x266   :  { %944 = vmatmul.mubr.msk.f32.vlgmr.msra.gmra.mxu0 %vm280_vm5, %v35_v11  ;;  %949 = vmatprep.subr.mxu0 %v494_v14 }
 0x267   :  { %946 = vmatprep.mubr.msk.f32.mxu0 %vm280_vm5, %v36_v12  ;;  %950 = vmatpush3.msra.mxu0 %v494_v14 }
 0x268   :  { %951 = vmatprep.subr.mxu0 %v493_v15 }
 0x269   :  { %952 = vmatpush3.msra.mxu0 %v493_v15 }
 0x26a   :  { %947 = vmatmul.mubr.msk.f32.gmra.mxu0 %vm280_vm5, %v37_v13  ;;  %953 = vmatprep.subr.mxu0 %v492_v16 }
 0x26b   :  { %954 = vmatpush3.msra.mxu0 %v492_v16 }
 0x26c   :  { %955 = vmatprep.subr.mxu0 %v491_v17 }
 0x26d   :  { %956 = vmatpush3.msra.mxu0 %v491_v17 }
 0x326   :  { %v945_v20 = vpop.f32.mrf.mxu0 }
 0x327   :  { %v466_v21 = vadd.f32 %v945_v20, %v381_v19 }
 0x328   :  { %v460_v23 = vpop.f32.mrf.mxu0 }
 0x329   :  { %v461_v25 = vadd.f32 %v460_v23, %v381_v19  ;;  %v484_v26 = vmul.f32 0.01, %v466_v21  ;;  %vm480_vm10 = vcmp.gt.f32.partialorder %v466_v21, 0.0 }
 0x32a   :  { %v948_v27 = vpop.f32.mrf.mxu0 }
 0x32b   :  { %vm479_vm11 = vcmp.gt.f32.partialorder %v461_v25, 0.0  ;;  %v483_v28 = vmul.f32 0.01, %v461_v25  ;;  %v476_v29 = vadd.f32 %v948_v27, %v381_v19  ;;  %v488_v33 = vsel %vm480_vm10, %v466_v21, %v484_v26 }
 0x32c   :  { %v470_v30 = vpop.f32.mrf.mxu0 }
 0x32d   :  { %v471_v31 = vadd.f32 %v470_v30, %v381_v19  ;;  %v487_v32 = vsel %vm479_vm11, %v461_v25, %v483_v28  ;;  %v486_v34 = vmul.f32 0.01, %v476_v29  ;;  %vm482_vm12 = vcmp.gt.f32.partialorder %v476_v29, 0.0 }
 0x32e   :  { %957 = vmatprep.mubr.msk.f32.mxu0 %vm280_vm5, %v487_v32 }
 0x32f   :  { %vm481_vm13 = vcmp.gt.f32.partialorder %v471_v31, 0.0  ;;  %v485_v35 = vmul.f32 0.01, %v471_v31  ;;  %958 = vmatmul.mubr.msk.f32.vlgmr.msra.gmra.mxu0 %vm280_vm5, %v488_v33  ;;  %v490_v37 = vsel %vm482_vm12, %v476_v29, %v486_v34 }
 0x331   :  { %v489_v36 = vsel %vm481_vm13, %v471_v31, %v485_v35 }
 0x332   :  { %960 = vmatprep.mubr.msk.f32.mxu0 %vm280_vm5, %v489_v36 }
 0x333   :  { %961 = vmatmul.mubr.msk.f32.gmra.mxu0 %vm280_vm5, %v490_v37 }
 0x334   :  { %971 = vmatprep.mubr.msk.f32.mxu0 %vm280_vm5, %v1158_v0  ;;  %v769_v0 = vrot.slane %v1134_v24, %v768_v62 }
 0x3ef   :  { %v959_v38 = vpop.f32.mrf.mxu0 }
 0x3f1   :  { %v573_v39 = vpop.f32.mrf.mxu0 }
 0x3f3   :  { %v962_v40 = vpop.f32.mrf.mxu0 }
 0x3f4   :  { %963 = vmatprep.subr.mxu0 %v962_v40 }
 0x3f5   :  { %v583_v41 = vpop.f32.mrf.mxu0  ;;  %964 = vmatpush3.msra.mxu0 %v962_v40 }
 0x3f6   :  { %965 = vmatprep.subr.mxu0 %v583_v41 }
 0x3f7   :  { %966 = vmatpush3.msra.mxu0 %v583_v41 }
 0x3f8   :  { %967 = vmatprep.subr.mxu0 %v959_v38 }
 0x3f9   :  { %968 = vmatpush3.msra.mxu0 %v959_v38 }
 0x3fa   :  { %969 = vmatprep.subr.mxu0 %v573_v39 }
 0x3fb   :  { %970 = vmatpush3.msra.mxu0 %v573_v39 }
 0x3fc   :  { %972 = vmatmul.mubr.msk.f32.vlgmr.msra.gmra.mxu0 %vm280_vm5, %v35_v11 }
 0x3fd   :  { %974 = vmatprep.mubr.msk.f32.mxu0 %vm280_vm5, %v36_v12 }
 0x400   :  { %975 = vmatmul.mubr.msk.f32.gmra.mxu0 %vm280_vm5, %v37_v13 }
 0x4bc   :  { %v973_v44 = vpop.f32.mrf.mxu0 }
 0x4bd   :  { %v668_v48 = vadd.f32 %v973_v44, %v595_v45 }
 0x4be   :  { %v662_v46 = vpop.f32.mrf.mxu0 }
 0x4bf   :  { %v663_v51 = vadd.f32 %v662_v46, %v595_v45  ;;  %v686_v54 = vmul.f32 0.01, %v668_v48  ;;  %vm682_vm1 = vcmp.gt.f32.partialorder %v668_v48, 0.0 }
 0x4c0   :  { %v976_v47 = vpop.f32.mrf.mxu0 }
 0x4c1   :  { %v678_v49 = vadd.f32 %v976_v47, %v595_v45  ;;  %v685_v57 = vmul.f32 0.01, %v663_v51  ;;  %vm681_vm2 = vcmp.gt.f32.partialorder %v663_v51, 0.0  ;;  %v690_v59 = vsel %vm682_vm1, %v668_v48, %v686_v54 }
 0x4c2   :  { %v672_v50 = vpop.f32.mrf.mxu0 }
 0x4c3   :  { %vm684_vm15 = vcmp.gt.f32.partialorder %v678_v49, 0.0  ;;  %v688_v52 = vmul.f32 0.01, %v678_v49  ;;  %v673_v53 = vadd.f32 %v672_v50, %v595_v45  ;;  %v689_v61 = vsel %vm681_vm2, %v663_v51, %v685_v57 }
 0x4c5   :  { %vm683_vm0 = vcmp.gt.f32.partialorder %v673_v53, 0.0  ;;  %v687_v55 = vmul.f32 0.01, %v673_v53  ;;  %v692_v56 = vsel %vm684_vm15, %v678_v49, %v688_v52 }
 0x4c6   :  { %978 = vmatpush3.msra.mxu1 %v692_v56 }
 0x4c7   :  { %979 = vmatprep.subr.mxu1 %v1013_v42  ;;  %v691_v58 = vsel %vm683_vm0, %v673_v53, %v687_v55 }
 0x4c8   :  { %980 = vmatpush3.msra.mxu1 %v691_v58 }
 0x4c9   :  { %981 = vmatprep.subr.mxu1 %v1013_v42 }
 0x4ca   :  { %982 = vmatpush3.msra.mxu1 %v690_v59 }
 0x4cb   :  { %983 = vmatprep.subr.mxu1 %v1013_v42 }
 0x4cc   :  { %984 = vmatpush3.msra.mxu1 %v689_v61 }
 0x4cd   :  { %986 = vmatmul.mubr.msk.f32.vlgmr.msra.gmra.mxu1 %vm280_vm5, %v38_v60 }
 0x58d   :  { %v762_v2 = vpop.f32.mrf.mxu1 }
 0x58e   :  { %v770_v3 = vmul.f32 %v769_v0, %v762_v2 }
 0x58f   :  { %v987_v4 = vpop.f32.mrf.mxu1 }
 0x590   :  { %v775_v5 = vadd.f32 %v774_v1, %v770_v3 }
 0x592   :  { %777 = vst.msk [vmem:[#allocation2] sm:$0x3] %vm776_vm3, %v775_v5 }
 0x593   :  { %1002 = shalt.err (!%p999_p4)
}
 0x594   :  { %787 = dma.vmem_to_hbm [thread:$0]  %s785_s22, 32, %s1220_s8, [#allocation3]  }
 0x595   :  { %1011 = dma.done.wait [#allocation3], 32  }
 0x596   :  { %1012 = vsyncadd [#allocation3], 4294967264 }
 0x597   :  { %791 = vsyncpa [#allocation3], 1 }

</bundles_post_ra>
